<compile_context>
chip_gen: v7x
topology: tpu7x:2x2x1
jax: 0.10.0
libtpu: 0.0.40
codegen_flags: <defaults>
</compile_context>

<pallas_src>
import jax
import jax.numpy as jnp
from jax.experimental import pallas as pl
from jax.experimental.pallas import tpu as pltpu

NEG_SLOPE = 0.02  # LeakyReLU negative_slope
LANE = 128


def _cdiv(a, b):
    return (a + b - 1) // b


def _round_up(n, m):
    return _cdiv(n, m) * m


def _feature_kernel(xp_ref, wc_ref, bc_ref, w1_ref, b1_ref,
                    w2_ref, b2_ref, w3_ref, b3_ref, out_ref):
    # xp_ref: (T*16, TB) -- already max-pooled volume, batch on the 128-lane axis.
    def leaky(v):
        return jnp.maximum(v, NEG_SLOPE * v)        # exact for negative_slope in (0,1)

    pooled = xp_ref[...]                                                           # (T16, TB) bf16
    # Conv3d with a full-extent (T,4,4) kernel == one matmul over the pooled volume.
    # TODO(synk): Dropout3d / Dropout are identity in eval mode; training-mode RNG masks not applied.
    h = jnp.dot(wc_ref[...], pooled, preferred_element_type=jnp.float32) + bc_ref[...]      # (10, TB)
    h = leaky(h)
    h = leaky(jnp.dot(w1_ref[...], h.astype(w1_ref.dtype),
                      preferred_element_type=jnp.float32) + b1_ref[...])                    # (40, TB)
    h = leaky(jnp.dot(w2_ref[...], h.astype(w2_ref.dtype),
                      preferred_element_type=jnp.float32) + b2_ref[...])                    # (20, TB)
    out_ref[...] = (jnp.dot(w3_ref[...], h.astype(w3_ref.dtype),
                            preferred_element_type=jnp.float32) + b3_ref[...])              # (1, TB)


def feature_model_forward(x, params, *, batch_tile=8192, compute_dtype=jnp.bfloat16):
    """x: (B, 1, T, 8, 8) float32  ->  (B, 1) float32."""
    conv_w, conv_b, fc1_w, fc1_b, fc2_w, fc2_b, fc3_w, fc3_b = params
    B, C, T, H, W = x.shape
    assert C == 1 and H == 8 and W == 8
    T16 = T * 16
    F = conv_w.shape[0]
    U1, U2 = fc1_w.shape[0], fc2_w.shape[0]

    itemsize = jnp.dtype(compute_dtype).itemsize
    # Cap the batch tile so the double-buffered pooled input stays <= ~12 MiB (safe on all gens).
    vmem_cap_tb = max(LANE, ((12 << 20) // (2 * T16 * itemsize)) // LANE * LANE)
    batch_tile = max(LANE, min(_round_up(batch_tile, LANE), vmem_cap_tb))

    # Divisor-based tiling: bounds zero-padding to <128 columns per tile, and splits any batch
    # larger than one vreg row of lanes into >=2 tiles so v7x's second TensorCore isn't idle.
    ntiles = _cdiv(B, batch_tile)
    if ntiles == 1 and B > LANE:
        ntiles = 2
    TB = _round_up(_cdiv(B, ntiles), LANE)
    Bp = ntiles * TB

    # Single fused wrapper materialization: MaxPool3d(1,2,2) FIRST (4x data reduction), then the
    # batch-to-lanes transpose + compute_dtype cast + zero-pad of the already-pooled volume.
    pooled = (x[:, 0]
              .reshape(B, T, 4, 2, 4, 2)          # (b, t, i, di, j, dj)
              .max(axis=(3, 5))                   # (B, T, 4, 4) == MaxPool3d(kernel=(1,2,2))
              .reshape(B, T16)
              .T                                  # (T16, B) -- batch becomes the lane axis
              .astype(compute_dtype))
    if Bp != B:
        xp = jnp.zeros((T16, Bp), compute_dtype).at[:, :B].set(pooled)
    else:
        xp = pooled

    # Weights stay in PyTorch (out_features, in_features) orientation; matmul operands in bf16
    # (f32 accumulation), biases in f32.
    wc = conv_w[:, 0].reshape(F, T16).astype(compute_dtype)      # (10, T*16)
    bc = conv_b.reshape(F, 1).astype(jnp.float32)
    w1 = fc1_w.astype(compute_dtype); b1 = fc1_b.reshape(-1, 1).astype(jnp.float32)
    w2 = fc2_w.astype(compute_dtype); b2 = fc2_b.reshape(-1, 1).astype(jnp.float32)
    w3 = fc3_w.astype(compute_dtype); b3 = fc3_b.reshape(-1, 1).astype(jnp.float32)

    flops = 2 * Bp * (T16 * F + F * U1 + U1 * U2 + U2 * 1)
    bytes_accessed = (xp.size * itemsize
                      + (wc.size + w1.size + w2.size + w3.size) * itemsize
                      + (bc.size + b1.size + b2.size + b3.size) * 4
                      + Bp * 4)

    out = pl.pallas_call(
        _feature_kernel,
        out_shape=jax.ShapeDtypeStruct((1, Bp), jnp.float32),
        grid=(ntiles,),
        in_specs=[
            pl.BlockSpec((T16, TB), lambda i: (0, i)),   # streamed, pooled batch tiles
            pl.BlockSpec((F, T16), lambda i: (0, 0)),    # conv weight (VMEM-resident)
            pl.BlockSpec((F, 1), lambda i: (0, 0)),
            pl.BlockSpec(w1.shape, lambda i: (0, 0)),
            pl.BlockSpec(b1.shape, lambda i: (0, 0)),
            pl.BlockSpec(w2.shape, lambda i: (0, 0)),
            pl.BlockSpec(b2.shape, lambda i: (0, 0)),
            pl.BlockSpec(w3.shape, lambda i: (0, 0)),
            pl.BlockSpec(b3.shape, lambda i: (0, 0)),
        ],
        out_specs=pl.BlockSpec((1, TB), lambda i: (0, i)),      # lane-dense output store
        compiler_params=pltpu.CompilerParams(
            dimension_semantics=("parallel",),                  # shard batch tiles over TCs (v7x)
            vmem_limit_bytes=48 * 1024 * 1024,                  # explicit; within v7x's 64 MiB
        ),
        cost_estimate=pl.CostEstimate(flops=flops, transcendentals=0,
                                      bytes_accessed=bytes_accessed),
    )(xp, wc, bc, w1, b1, w2, b2, w3, b3)

    return out[:, :B].T                                         # (B, 1), PyTorch layout


def init_params(key, T, num_filters=10, fc_units=(40, 20)):
    """Deterministic synthetic parameters matching FeatureModel.__init__ shapes."""
    ks = jax.random.split(key, 8)
    s = 0.1
    conv_w = s * jax.random.normal(ks[0], (num_filters, 1, T, 4, 4), jnp.float32)
    conv_b = s * jax.random.normal(ks[1], (num_filters,), jnp.float32)
    fc1_w = s * jax.random.normal(ks[2], (fc_units[0], num_filters), jnp.float32)
    fc1_b = s * jax.random.normal(ks[3], (fc_units[0],), jnp.float32)
    fc2_w = s * jax.random.normal(ks[4], (fc_units[1], fc_units[0]), jnp.float32)
    fc2_b = s * jax.random.normal(ks[5], (fc_units[1],), jnp.float32)
    fc3_w = s * jax.random.normal(ks[6], (1, fc_units[1]), jnp.float32)
    fc3_b = s * jax.random.normal(ks[7], (1,), jnp.float32)
    return conv_w, conv_b, fc1_w, fc1_b, fc2_w, fc2_b, fc3_w, fc3_b


def reference_forward(x, params, *, q=lambda a: a):
    """Pure-JAX reference of the PyTorch forward (eval mode).

    `q` optionally rounds matmul operands (e.g. to bf16) to mirror the kernel's precision.
    """
    conv_w, conv_b, fc1_w, fc1_b, fc2_w, fc2_b, fc3_w, fc3_b = params
    B, _, T, H, W = x.shape
    pooled = x[:, 0].reshape(B, T, H // 2, 2, W // 2, 2).max(axis=(3, 5))   # MaxPool3d (1,2,2)

    def leaky(v):
        return jnp.where(v >= 0.0, v, NEG_SLOPE * v)

    h = jnp.einsum('btij,ftij->bf', q(pooled), q(conv_w[:, 0])) + conv_b    # Conv3d full-extent
    h = leaky(h)
    h = leaky(q(h) @ q(fc1_w).T + fc1_b)
    h = leaky(q(h) @ q(fc2_w).T + fc2_b)
    return q(h) @ q(fc3_w).T + fc3_b


if __name__ == "__main__":
    B, T = 2, 8                      # batch=2, signal_window_size=8
    key = jax.random.PRNGKey(0)
    kx, kp = jax.random.split(key)

    x = jax.random.normal(kx, (B, 1, T, 8, 8), jnp.float32)
    params = init_params(kp, T)

    fwd = jax.jit(feature_model_forward)
    out = jax.block_until_ready(fwd(x, params))
    assert out.shape == (B, 1), out.shape

    # Tight check: reference with the same bf16 rounding of matmul operands as the kernel.
    q_bf16 = lambda a: a.astype(jnp.bfloat16).astype(jnp.float32)
    ref_q = reference_forward(x, params, q=q_bf16)
    assert jnp.allclose(out, ref_q, atol=1e-2, rtol=1e-2), (out, ref_q)

    # Loose check against the pure-f32 PyTorch-equivalent forward (bounds bf16 rounding).
    ref = reference_forward(x, params)
    assert jnp.allclose(out, ref, atol=5e-2, rtol=5e-2), (out, ref)

    print("KERNEL_OK")
</pallas_src>

<mosaic_0001>
module attributes {stable_mosaic.version = 11 : i64} {
  func.func @_feature_kernel(%arg0: i32, %arg1: memref<128x128xbf16, #tpu.memory_space<vmem>>, %arg2: memref<10x128xbf16, #tpu.memory_space<vmem>>, %arg3: memref<10x1xf32, #tpu.memory_space<vmem>>, %arg4: memref<40x10xbf16, #tpu.memory_space<vmem>>, %arg5: memref<40x1xf32, #tpu.memory_space<vmem>>, %arg6: memref<20x40xbf16, #tpu.memory_space<vmem>>, %arg7: memref<20x1xf32, #tpu.memory_space<vmem>>, %arg8: memref<1x20xbf16, #tpu.memory_space<vmem>>, %arg9: memref<1x1xf32, #tpu.memory_space<vmem>>, %arg10: memref<1x128xf32, #tpu.memory_space<vmem>>) attributes {dimension_semantics = [#tpu.dimension_semantics<parallel>], iteration_bounds = array<i64: 1>, scalar_prefetch = 0 : i64, scratch_operands = 0 : i64, tpu.core_type = #tpu.core_type<tc>, window_params = [{transform_indices = @transform_0, window_bounds = array<i64: 128, 128>}, {pipeline_mode = #tpu.pipeline_mode<synchronous>, transform_indices = @transform_1, window_bounds = array<i64: 10, 128>}, {pipeline_mode = #tpu.pipeline_mode<synchronous>, transform_indices = @transform_2, window_bounds = array<i64: 10, 1>}, {pipeline_mode = #tpu.pipeline_mode<synchronous>, transform_indices = @transform_3, window_bounds = array<i64: 40, 10>}, {pipeline_mode = #tpu.pipeline_mode<synchronous>, transform_indices = @transform_4, window_bounds = array<i64: 40, 1>}, {pipeline_mode = #tpu.pipeline_mode<synchronous>, transform_indices = @transform_5, window_bounds = array<i64: 20, 40>}, {pipeline_mode = #tpu.pipeline_mode<synchronous>, transform_indices = @transform_6, window_bounds = array<i64: 20, 1>}, {pipeline_mode = #tpu.pipeline_mode<synchronous>, transform_indices = @transform_7, window_bounds = array<i64: 1, 20>}, {pipeline_mode = #tpu.pipeline_mode<synchronous>, transform_indices = @transform_8, window_bounds = array<i64: 1, 1>}, {transform_indices = @transform_9, window_bounds = array<i64: 1, 128>}]} {
    %c0 = arith.constant 0 : index
    %c0_0 = arith.constant 0 : index
    %0 = vector.load %arg1[%c0, %c0_0] : memref<128x128xbf16, #tpu.memory_space<vmem>>, vector<128x128xbf16>
    %c0_1 = arith.constant 0 : index
    %c0_2 = arith.constant 0 : index
    %1 = vector.load %arg2[%c0_1, %c0_2] : memref<10x128xbf16, #tpu.memory_space<vmem>>, vector<10x128xbf16>
    %cst = arith.constant dense<0.000000e+00> : vector<10x128xf32>
    %2 = tpu.matmul %1, %0, %cst {dimension_numbers = #tpu.dot_dimension_numbers<[1], [0], [0], [1], [0, 0, 1, 1], [], []>} : vector<10x128xbf16>, vector<128x128xbf16>, vector<10x128xf32> -> vector<10x128xf32>
    %c0_3 = arith.constant 0 : index
    %c0_4 = arith.constant 0 : index
    %3 = vector.load %arg3[%c0_3, %c0_4] : memref<10x1xf32, #tpu.memory_space<vmem>>, vector<10x1xf32>
    %4 = vector.broadcast %3 : vector<10x1xf32> to vector<10x128xf32>
    %5 = arith.addf %2, %4 : vector<10x128xf32>
    %cst_5 = arith.constant 2.000000e-02 : f32
    %6 = vector.broadcast %cst_5 : f32 to vector<10x128xf32>
    %7 = arith.mulf %6, %5 : vector<10x128xf32>
    %8 = arith.maximumf %5, %7 : vector<10x128xf32>
    %c0_6 = arith.constant 0 : index
    %c0_7 = arith.constant 0 : index
    %9 = vector.load %arg4[%c0_6, %c0_7] : memref<40x10xbf16, #tpu.memory_space<vmem>>, vector<40x10xbf16>
    %10 = arith.truncf %8 : vector<10x128xf32> to vector<10x128xbf16>
    %cst_8 = arith.constant dense<0.000000e+00> : vector<40x128xf32>
    %11 = tpu.matmul %9, %10, %cst_8 {dimension_numbers = #tpu.dot_dimension_numbers<[1], [0], [0], [1], [0, 0, 1, 1], [], []>} : vector<40x10xbf16>, vector<10x128xbf16>, vector<40x128xf32> -> vector<40x128xf32>
    %c0_9 = arith.constant 0 : index
    %c0_10 = arith.constant 0 : index
    %12 = vector.load %arg5[%c0_9, %c0_10] : memref<40x1xf32, #tpu.memory_space<vmem>>, vector<40x1xf32>
    %13 = vector.broadcast %12 : vector<40x1xf32> to vector<40x128xf32>
    %14 = arith.addf %11, %13 : vector<40x128xf32>
    %cst_11 = arith.constant 2.000000e-02 : f32
    %15 = vector.broadcast %cst_11 : f32 to vector<40x128xf32>
    %16 = arith.mulf %15, %14 : vector<40x128xf32>
    %17 = arith.maximumf %14, %16 : vector<40x128xf32>
    %c0_12 = arith.constant 0 : index
    %c0_13 = arith.constant 0 : index
    %18 = vector.load %arg6[%c0_12, %c0_13] : memref<20x40xbf16, #tpu.memory_space<vmem>>, vector<20x40xbf16>
    %19 = arith.truncf %17 : vector<40x128xf32> to vector<40x128xbf16>
    %cst_14 = arith.constant dense<0.000000e+00> : vector<20x128xf32>
    %20 = tpu.matmul %18, %19, %cst_14 {dimension_numbers = #tpu.dot_dimension_numbers<[1], [0], [0], [1], [0, 0, 1, 1], [], []>} : vector<20x40xbf16>, vector<40x128xbf16>, vector<20x128xf32> -> vector<20x128xf32>
    %c0_15 = arith.constant 0 : index
    %c0_16 = arith.constant 0 : index
    %21 = vector.load %arg7[%c0_15, %c0_16] : memref<20x1xf32, #tpu.memory_space<vmem>>, vector<20x1xf32>
    %22 = vector.broadcast %21 : vector<20x1xf32> to vector<20x128xf32>
    %23 = arith.addf %20, %22 : vector<20x128xf32>
    %cst_17 = arith.constant 2.000000e-02 : f32
    %24 = vector.broadcast %cst_17 : f32 to vector<20x128xf32>
    %25 = arith.mulf %24, %23 : vector<20x128xf32>
    %26 = arith.maximumf %23, %25 : vector<20x128xf32>
    %c0_18 = arith.constant 0 : index
    %c0_19 = arith.constant 0 : index
    %27 = vector.load %arg8[%c0_18, %c0_19] : memref<1x20xbf16, #tpu.memory_space<vmem>>, vector<1x20xbf16>
    %28 = arith.truncf %26 : vector<20x128xf32> to vector<20x128xbf16>
    %cst_20 = arith.constant dense<0.000000e+00> : vector<1x128xf32>
    %29 = tpu.matmul %27, %28, %cst_20 {dimension_numbers = #tpu.dot_dimension_numbers<[1], [0], [0], [1], [0, 0, 1, 1], [], []>} : vector<1x20xbf16>, vector<20x128xbf16>, vector<1x128xf32> -> vector<1x128xf32>
    %c0_21 = arith.constant 0 : index
    %c0_22 = arith.constant 0 : index
    %30 = vector.load %arg9[%c0_21, %c0_22] : memref<1x1xf32, #tpu.memory_space<vmem>>, vector<1x1xf32>
    %31 = vector.broadcast %30 : vector<1x1xf32> to vector<1x128xf32>
    %32 = arith.addf %29, %31 : vector<1x128xf32>
    %c0_23 = arith.constant 0 : index
    %c0_24 = arith.constant 0 : index
    %33 = vector.load %arg10[%c0_23, %c0_24] : memref<1x128xf32, #tpu.memory_space<vmem>>, vector<1x128xf32>
    tpu.vector_store %arg10[%c0_23, %c0_24], %32 {strides = array<i32>} : memref<1x128xf32, #tpu.memory_space<vmem>>, vector<1x128xf32>,
    return
  }
  func.func @transform_0(%arg0: i32) -> (i32, i32) {
    %c0_i32 = arith.constant 0 : i32
    %c0_i32_0 = arith.constant 0 : i32
    return %c0_i32, %arg0 : i32, i32
  }
  func.func @transform_1(%arg0: i32) -> (i32, i32) {
    %c0_i32 = arith.constant 0 : i32
    %c0_i32_0 = arith.constant 0 : i32
    %c0_i32_1 = arith.constant 0 : i32
    return %c0_i32, %c0_i32_0 : i32, i32
  }
  func.func @transform_2(%arg0: i32) -> (i32, i32) {
    %c0_i32 = arith.constant 0 : i32
    %c0_i32_0 = arith.constant 0 : i32
    %c0_i32_1 = arith.constant 0 : i32
    return %c0_i32, %c0_i32_0 : i32, i32
  }
  func.func @transform_3(%arg0: i32) -> (i32, i32) {
    %c0_i32 = arith.constant 0 : i32
    %c0_i32_0 = arith.constant 0 : i32
    %c0_i32_1 = arith.constant 0 : i32
    return %c0_i32, %c0_i32_0 : i32, i32
  }
  func.func @transform_4(%arg0: i32) -> (i32, i32) {
    %c0_i32 = arith.constant 0 : i32
    %c0_i32_0 = arith.constant 0 : i32
    %c0_i32_1 = arith.constant 0 : i32
    return %c0_i32, %c0_i32_0 : i32, i32
  }
  func.func @transform_5(%arg0: i32) -> (i32, i32) {
    %c0_i32 = arith.constant 0 : i32
    %c0_i32_0 = arith.constant 0 : i32
    %c0_i32_1 = arith.constant 0 : i32
    return %c0_i32, %c0_i32_0 : i32, i32
  }
  func.func @transform_6(%arg0: i32) -> (i32, i32) {
    %c0_i32 = arith.constant 0 : i32
    %c0_i32_0 = arith.constant 0 : i32
    %c0_i32_1 = arith.constant 0 : i32
    return %c0_i32, %c0_i32_0 : i32, i32
  }
  func.func @transform_7(%arg0: i32) -> (i32, i32) {
    %c0_i32 = arith.constant 0 : i32
    %c0_i32_0 = arith.constant 0 : i32
    %c0_i32_1 = arith.constant 0 : i32
    return %c0_i32, %c0_i32_0 : i32, i32
  }
  func.func @transform_8(%arg0: i32) -> (i32, i32) {
    %c0_i32 = arith.constant 0 : i32
    %c0_i32_0 = arith.constant 0 : i32
    %c0_i32_1 = arith.constant 0 : i32
    return %c0_i32, %c0_i32_0 : i32, i32
  }
  func.func @transform_9(%arg0: i32) -> (i32, i32) {
    %c0_i32 = arith.constant 0 : i32
    %c0_i32_0 = arith.constant 0 : i32
    return %c0_i32, %arg0 : i32, i32
  }
}

</mosaic_0001>

<bundles_post_ra>
// kernel: feature_model_forward.1
= control target key start
LH: loop header
LB: loop body
LE: loop exit
PB: predicated region body
PF: predicated region fallthrough
CT: control target
= control target key end

     0   :  { %v569_v0 = vmov 0.0   ;;  %vm570_vm0 = vmmov 0   ;;  %v571_v3 = vmov 0   ;;  %vm223_vm1 = vcmask 1044480   ;;  %s726_s0 = inlined_call_operand.vmem [shape: bf16[128,128], index: 0, kind: input, shape index: {}]   ;;  %s727_s8 = inlined_call_operand.<no memory space> [shape: f32[1,1], index: 8, kind: input, shape index: {}]   ;;  %s728_s2 = inlined_call_operand.vmem [shape: f32[10,1], index: 2, kind: input, shape index: {}]   ;;  %s729_s1 = inlined_call_operand.vmem [shape: bf16[10,128], index: 1, kind: input, shape index: {}]   ;;  %s730_s4 = inlined_call_operand.vmem [shape: f32[40,1], index: 4, kind: input, shape index: {}]   ;;  %s731_s6 = inlined_call_operand.vmem [shape: f32[20,1], index: 6, kind: input, shape index: {}]   ;;  %s732_s3 = inlined_call_operand.vmem [shape: bf16[40,10], index: 3, kind: input, shape index: {}]   ;;  %s733_s5 = inlined_call_operand.vmem [shape: bf16[20,40], index: 5, kind: input, shape index: {}]   ;;  %s734_s7 = inlined_call_operand.vmem [shape: bf16[1,20], index: 7, kind: input, shape index: {}]   ;;  %s735_s9 = inlined_call_operand.vmem [shape: f32[1,128], index: 9, kind: output, shape index: {}]  }
   0x1   :  { %497 = vmatprep.subr.bf16.mxu0 %v569_v0  ;;  %v555_v1 = vld [vmem:[%s726_s0] sm:$0xff]   ;;  %513 = vmatprep.mubr.msk.bf16.mxu0 %vm570_vm0, %v569_v0  ;;  %v14_v2 = vstv %s727_s8  ;;  %v556_v4 = vld [vmem:[%s726_s0 + $0x8] sm:$0xff]   ;;  %v557_v5 = vld [vmem:[%s726_s0 + $0x10] sm:$0xff]   ;;  %vm213_vm2 = vcmask 80896   ;;  %vm325_vm3 = vcmask 326656   ;;  %vm332_vm4 = vcmask 1043456  }
   0x2   :  { %553 = vset.pattern.permute.xlu0 %v571_v3  ;;  %15 = vst [vmem:[#allocation2] sm:$0x1] %v14_v2  ;;  %517 = vmatprep.subr.bf16.mxu1 %v569_v0  ;;  %v53_v6 = vld [vmem:[%s728_s2] sm:$0xff]  ;;  %v558_v7 = vld [vmem:[%s726_s0 + $0x18] sm:$0xff]   ;;  %v54_v8 = vld [vmem:[%s728_s2 + $0x8] sm:$0x3] }
   0x3   :  { %498 = vmatpush3.bf16.msra.mxu0 %v555_v1  ;;  %519 = vmatprep.mubr.msk.bf16.mxu1 %vm570_vm0, %v569_v0  ;;  %v559_v9 = vld [vmem:[%s726_s0 + $0x20] sm:$0xff]   ;;  %v172_v10 = vld [vmem:[%s730_s4 + $0x10] sm:$0xff]  ;;  %v560_v11 = vld [vmem:[%s726_s0 + $0x28] sm:$0xff]   ;;  %vm407_vm5 = vcmask 1041408   ;;  %vm403_vm6 = vcmask 162816  }
   0x4   :  { %499 = vmatprep.subr.bf16.mxu0 %v569_v0  ;;  %554 = vset.pattern.permute.xlu1 %v571_v3  ;;  %v174_v12 = vld [vmem:[%s730_s4 + $0x20] sm:$0xff]  ;;  %v561_v13 = vld [vmem:[%s726_s0 + $0x30] sm:$0xff]   ;;  %v300_v14 = vld [vmem:[%s731_s6 + $0x8] sm:$0xff] }
   0x5   :  { %57 = vperm.xlu0 %553, %v53_v6   ;;  %v562_v15 = vld [vmem:[%s726_s0 + $0x38] sm:$0xff]   ;;  %v563_v17 = vld [vmem:[%s729_s1] sm:$0x1f]   ;;  %v171_v19 = vld [vmem:[%s730_s4 + $0x8] sm:$0xff] }
   0x6   :  { %v170_v18 = vld [vmem:[%s730_s4] sm:$0xff]  ;;  %v173_v20 = vld [vmem:[%s730_s4 + $0x18] sm:$0xff]  ;;  %v301_v22 = vld [vmem:[%s731_s6 + $0x10] sm:$0xf] }
   0x7   :  { %500 = vmatpush3.bf16.msra.mxu0 %v556_v4  ;;  %177 = vperm.xlu1 %554, %v170_v18   ;;  %v299_v21 = vld [vmem:[%s731_s6] sm:$0xff]  ;;  %v565_v38 = vld [vmem:[%s732_s3 + $0x8] sm:$0xff]   ;;  %v566_v39 = vld [vmem:[%s732_s3 + $0x10] ss:$0 sps:$4 sm:$0xff]  }
   0x8   :  { %501 = vmatprep.subr.bf16.mxu0 %v569_v0  ;;  %v564_v37 = vld [vmem:[%s732_s3] sm:$0xff]  }
   0x9   :  { %62 = vperm.xlu0 %553, %v54_v8   ;;  %v393_v16 = vld [vmem:[#allocation2] sm:$0x1] }
   0xa   :  { %v567_v40 = vld [vmem:[%s733_s5] sm:$0xff]  }
   0xb   :  { %502 = vmatpush3.bf16.msra.mxu0 %v557_v5  ;;  %182 = vperm.xlu1 %554, %v171_v19  }
   0xc   :  { %503 = vmatprep.subr.bf16.mxu0 %v569_v0 }
   0xd   :  { %187 = vperm.xlu0 %553, %v172_v10  }
   0xf   :  { %504 = vmatpush3.bf16.msra.mxu0 %v558_v7  ;;  %192 = vperm.xlu1 %554, %v173_v20  }
  0x10   :  { %505 = vmatprep.subr.bf16.mxu0 %v569_v0 }
  0x11   :  { %197 = vperm.xlu0 %553, %v174_v12  }
  0x13   :  { %506 = vmatpush3.bf16.msra.mxu0 %v559_v9  ;;  %304 = vperm.xlu1 %554, %v299_v21  }
  0x14   :  { %507 = vmatprep.subr.bf16.mxu0 %v569_v0 }
  0x15   :  { %309 = vperm.xlu0 %553, %v300_v14   ;;  %v568_v14 = vld [vmem:[%s733_s5 + $0x8] ss:$0 sps:$4 sm:$0x33]  }
  0x17   :  { %508 = vmatpush3.bf16.msra.mxu0 %v560_v11  ;;  %314 = vperm.xlu1 %554, %v301_v22  }
  0x18   :  { %509 = vmatprep.subr.bf16.mxu0 %v569_v0 }
  0x19   :  { %396 = vperm.xlu0 %553, %v393_v16  }
  0x1b   :  { %510 = vmatpush3.bf16.msra.mxu0 %v561_v13 }
  0x1c   :  { %511 = vmatprep.subr.bf16.mxu0 %v569_v0 }
  0x1f   :  { %512 = vmatpush3.bf16.msra.mxu0 %v562_v15 }
  0x22   :  { %514 = vmatmul.mubr.bf16.vlgmr.msra.gmra.mrb[0].mxu0 %v563_v17 }
  0x84   :  { %v58_v23 = vpop.permute.xlu0 %57 }
  0x86   :  { %v178_v41 = vpop.permute.xlu1 %177 }
  0x88   :  { %v63_v27 = vpop.permute.xlu0 %62 }
  0x8a   :  { %v183_v45 = vpop.permute.xlu1 %182 }
  0x8c   :  { %v188_v53 = vpop.permute.xlu0 %187 }
  0x8e   :  { %v193_v58 = vpop.permute.xlu1 %192 }
  0x90   :  { %v198_v3 = vpop.permute.xlu0 %197 }
  0x92   :  { %v305_v15 = vpop.permute.xlu1 %304 }
  0x94   :  { %v310_v22 = vpop.permute.xlu0 %309 }
  0x96   :  { %v315_v16 = vpop.permute.xlu1 %314 }
  0xf5   :  { %v153_v24 = vpop.f32.mrb[0].mxu0 }
  0xf6   :  { %v154_v25 = vadd.f32 %v153_v24, %v58_v23  ;;  %v515_v26 = vpop.f32.mrb[1].mxu0 }
  0xf7   :  { %v156_v28 = vpop.f32.mrb[2].mxu0 }
  0xf8   :  { %v160_v29 = vmul.f32 0.02, %v154_v25  ;;  %v157_v30 = vadd.f32 %v156_v28, %v63_v27  ;;  %v516_v31 = vpop.f32.mrb[3].mxu0 }
  0xfa   :  { %v161_v32 = vmul.f32 0.02, %v157_v30  ;;  %v162_v33 = vmax.f32 %v154_v25, %v160_v29 }
  0xfc   :  { %v163_v34 = vmax.f32 %v157_v30, %v161_v32 }
  0xfe   :  { %v169_v35 = vpack.c.bf16 %v163_v34, %v162_v33  ;;  %v390_v34 = vld [vmem:[%s734_s7] sm:$0x1] }
 0x100   :  { %v225_v36 = vsel %vm223_vm1, %v169_v35, 0  ;;  %v399_v35 = vlaneseq }
 0x101   :  { %518 = vmatpush3.bf16.msra.mxu1 %v225_v36 }
 0x102   :  { %v400_v36 = vshrl.u32 %v399_v35, 7 }
 0x104   :  { %520 = vmatmul.mubr.msk.bf16.vlgmr.msra.gmra.mrb[0].mxu1 %vm213_vm2, %v564_v37  ;;  %v401_v37 = vsub.s32 0, %v400_v36 }
 0x105   :  { %523 = vmatprep.mubr.msk.bf16.mxu1 %vm570_vm0, %v569_v0 }
 0x10c   :  { %524 = vmatmul.mubr.msk.bf16.gmra.mrb[4].mxu1 %vm213_vm2, %v565_v38  ;;  %v397_v38 = vpop.permute.xlu0 %396 }
 0x10d   :  { %527 = vmatprep.mubr.msk.bf16.mxu1 %vm570_vm0, %v569_v0 }
 0x114   :  { %528 = vmatmul.mubr.msk.bf16.gmra.mrb[8].mxu1 %vm213_vm2, %v566_v39  ;;  %v402_v39 = vrot.slane %v397_v38, %v401_v37 }
 0x115   :  { %537 = vmatprep.mubr.msk.bf16.mxu1 %vm325_vm3, %v567_v40 }
 0x1d7   :  { %v261_v42 = vpop.f32.mrb[0].mxu1 }
 0x1d8   :  { %v262_v43 = vadd.f32 %v261_v42, %v178_v41  ;;  %v521_v44 = vpop.f32.mrb[1].mxu1 }
 0x1d9   :  { %v264_v46 = vpop.f32.mrb[2].mxu1 }
 0x1da   :  { %v283_v47 = vmul.f32 0.02, %v262_v43  ;;  %v265_v48 = vadd.f32 %v264_v46, %v183_v45  ;;  %v522_v49 = vpop.f32.mrb[3].mxu1 }
 0x1dc   :  { %v284_v50 = vmul.f32 0.02, %v265_v48  ;;  %v288_v51 = vmax.f32 %v262_v43, %v283_v47 }
 0x1de   :  { %v289_v52 = vmax.f32 %v265_v48, %v284_v50 }
 0x1df   :  { %v269_v54 = vpop.f32.mrb[4].mxu1 }
 0x1e0   :  { %v270_v55 = vadd.f32 %v269_v54, %v188_v53  ;;  %v525_v56 = vpop.f32.mrb[5].mxu1  ;;  %v296_v57 = vpack.c.bf16 %v289_v52, %v288_v51 }
 0x1e1   :  { %v272_v59 = vpop.f32.mrb[6].mxu1 }
 0x1e2   :  { %v285_v60 = vmul.f32 0.02, %v270_v55  ;;  %v273_v61 = vadd.f32 %v272_v59, %v193_v58  ;;  %v526_v62 = vpop.f32.mrb[7].mxu1  ;;  %531 = vmatprep.subr.bf16.mxu1 %v296_v57 }
 0x1e3   :  { %532 = vmatpush3.bf16.msra.mxu1 %v296_v57 }
 0x1e4   :  { %v286_v63 = vmul.f32 0.02, %v273_v61  ;;  %v290_v1 = vmax.f32 %v270_v55, %v285_v60 }
 0x1e6   :  { %v291_v2 = vmax.f32 %v273_v61, %v286_v63 }
 0x1e7   :  { %v277_v4 = vpop.f32.mrb[8].mxu1 }
 0x1e8   :  { %v278_v5 = vadd.f32 %v277_v4, %v198_v3  ;;  %v529_v6 = vpop.f32.mrb[9].mxu1  ;;  %v297_v7 = vpack.c.bf16 %v291_v2, %v290_v1 }
 0x1e9   :  { %v280_v8 = vpop.f32.mrb[10].mxu1 }
 0x1ea   :  { %v287_v9 = vmul.f32 0.02, %v278_v5  ;;  %v530_v10 = vpop.f32.mrb[11].mxu1  ;;  %533 = vmatprep.subr.bf16.mxu1 %v297_v7 }
 0x1eb   :  { %534 = vmatpush3.bf16.msra.mxu1 %v297_v7 }
 0x1ec   :  { %v292_v11 = vmax.f32 %v278_v5, %v287_v9 }
 0x1ee   :  { %v298_v12 = vpack.c.bf16 %v292_v11, %v292_v11 }
 0x1f0   :  { %549 = vmatprep.subr.msk.bf16.mxu1 %vm332_vm4, %v298_v12  ;;  %v334_v13 = vsel %vm332_vm4, %v298_v12, 0 }
 0x1f1   :  { %536 = vmatpush3.bf16.msra.mxu1 %v334_v13 }
 0x1f2   :  { %541 = vmatprep.subr.bf16.mxu1 %v569_v0 }
 0x1f4   :  { %538 = vmatmul.mubr.msk.bf16.vlgmr.msra.gmra.mrb[12].mxu1 %vm325_vm3, %v568_v14 }
 0x1f5   :  { %545 = vmatprep.mubr.msk.bf16.mxu1 %vm570_vm0, %v569_v0 }
 0x2c7   :  { %v539_v17 = vpop.f32.mrb[12].mxu1 }
 0x2c8   :  { %v379_v18 = vadd.f32 %v539_v17, %v315_v16  ;;  %v370_v19 = vpop.f32.mrb[13].mxu1 }
 0x2c9   :  { %v371_v20 = vadd.f32 %v370_v19, %v305_v15  ;;  %v540_v21 = vpop.f32.mrb[14].mxu1 }
 0x2ca   :  { %v386_v23 = vmul.f32 0.02, %v379_v18  ;;  %v373_v24 = vpop.f32.mrb[15].mxu1 }
 0x2cb   :  { %v384_v25 = vmul.f32 0.02, %v371_v20  ;;  %v374_v26 = vadd.f32 %v373_v24, %v310_v22 }
 0x2cc   :  { %v389_v28 = vmax.f32 %v379_v18, %v386_v23 }
 0x2cd   :  { %v385_v27 = vmul.f32 0.02, %v374_v26  ;;  %v387_v29 = vmax.f32 %v371_v20, %v384_v25 }
 0x2ce   :  { %v392_v32 = vpack.c.bf16 %v389_v28, %v389_v28 }
 0x2cf   :  { %v388_v30 = vmax.f32 %v374_v26, %v385_v27 }
 0x2d0   :  { %v409_v33 = vsel %vm407_vm5, %v392_v32, 0 }
 0x2d1   :  { %v391_v31 = vpack.c.bf16 %v388_v30, %v387_v29 }
 0x2d3   :  { %542 = vmatpush3.bf16.msra.mxu1 %v391_v31 }
 0x2d4   :  { %543 = vmatprep.subr.bf16.mxu1 %v569_v0 }
 0x2d7   :  { %544 = vmatpush3.bf16.msra.mxu1 %v409_v33 }
 0x2da   :  { %546 = vmatmul.mubr.msk.bf16.vlgmr.msra.gmra.mrb[16].mxu1 %vm403_vm6, %v390_v34 }
 0x3ad   :  { %v445_v40 = vpop.f32.mrb[16].mxu1 }
 0x3ae   :  { %v446_v41 = vadd.f32 %v445_v40, %v402_v39  ;;  %v547_v42 = vpop.f32.mrb[17].mxu1 }
 0x3af   :  { %v448_v43 = vpop.f32.mrb[18].mxu1 }
 0x3b0   :  { %451 = vst [vmem:[%s735_s9] sm:$0x1] %v446_v41  ;;  %v548_v0 = vpop.f32.mrb[19].mxu1 }

</bundles_post_ra>
